<compile_context>
chip_gen: v5e
topology: v5e:2x2
jax: 0.10.0
libtpu: 0.0.40
codegen_flags: <defaults>
</compile_context>

<pallas_src>
import functools

import numpy as np
import jax
import jax.numpy as jnp
from jax import lax
from jax.experimental import pallas as pl
from jax.experimental.pallas import tpu as pltpu


def _conv3x3_prelu_kernel(x_ref, w_ref, m_ref, a_ref, o_ref, col_ref, *, W):
    """Fused per-depth-slab 3x3 conv + bias + single-alpha PReLU.

    x_ref:   (1, Cin, L)      lane-flattened depth slabs, L = d_block * H * W
    w_ref:   (Cout, K_pad)    weights, columns (kh, kw, ci) then bias column
    m_ref:   (9, L)           precomputed per-tap boundary masks (1.0 / 0.0)
    a_ref:   (1,)             PReLU alpha (SMEM scalar)
    o_ref:   (1, Cout, L)
    col_ref: (K_pad, L)       VMEM im2col scratch
    """
    Cin = x_ref.shape[1]
    L = x_ref.shape[2]
    K_pad = col_ref.shape[0]

    x = x_ref[0]  # (Cin, L), float32

    # im2col: 9 rolled, boundary-masked taps written straight into scratch.
    # The roll wrap-around is numerically dead: masks zero every lane whose
    # neighbor crosses a row / depth-slab / block boundary.
    k = 0
    for dh in (-1, 0, 1):
        for dw in (-1, 0, 1):
            delta = dh * W + dw  # static
            if delta == 0:
                t = x
            else:
                t = pltpu.roll(x, shift=(-delta) % L, axis=1)  # XLU, not vst
            if dh != 0 or dw != 0:
                t = t * m_ref[pl.ds(k, 1), :]  # (1, L) mask, broadcast over Cin
            col_ref[pl.ds(k * Cin, Cin), :] = t.astype(col_ref.dtype)
            k += 1

    # Bias row (ones) + zero padding rows up to K_pad (kept NaN-free).
    extra = K_pad - 9 * Cin
    row = lax.broadcasted_iota(jnp.int32, (extra, L), 0)
    col_ref[pl.ds(9 * Cin, extra), :] = jnp.where(row == 0, 1.0, 0.0).astype(
        col_ref.dtype)

    # Single fat matmul: (Cout, K_pad) @ (K_pad, L) -> (Cout, L), lane-dense.
    # Bias is folded in via the constant-ones row.
    acc = jnp.dot(w_ref[...], col_ref[...], preferred_element_type=jnp.float32)

    alpha = a_ref[0]
    out = jnp.where(acc >= 0, acc, alpha * acc)  # PReLU (shared alpha)
    o_ref[0] = out.astype(o_ref.dtype)


def _build_boundary_masks(H, W, L_blk):
    """(9, L_blk) float32: 1.0 where tap (dh, dw) reads a valid neighbor."""
    hw = H * W
    p = np.arange(L_blk)
    hh = (p % hw) // W
    ww = p % W
    masks = np.ones((9, L_blk), np.float32)
    k = 0
    for dh in (-1, 0, 1):
        for dw in (-1, 0, 1):
            m = np.ones(L_blk, bool)
            if dh == -1:
                m &= hh >= 1
            elif dh == 1:
                m &= hh <= H - 2
            if dw == -1:
                m &= ww >= 1
            elif dw == 1:
                m &= ww <= W - 2
            masks[k] = m.astype(np.float32)
            k += 1
    return jnp.asarray(masks)


def _vmem_capacity_bytes():
    try:
        info = pltpu.get_tpu_info()
        cap = int(getattr(info, "vmem_capacity_bytes", 0))
        if cap > 0:
            return cap
    except Exception:
        pass
    return 64 << 20  # conservative (v7x per-TC physical VMEM)


def _vmem_bytes_per_step(L, Cin, Cout, K_pad, compute_itemsize):
    f32 = 4
    io = 2 * (Cin + Cout) * L * f32          # double-buffered input/output blocks
    masks = 2 * 9 * L * f32                  # resident boundary masks
    col = K_pad * L * compute_itemsize       # im2col scratch
    temps = (2 * Cin + 2 * Cout) * L * f32   # rolled tap + acc/out temporaries
    return io + masks + col + temps


def _pick_d_block(N, D, H, W, Cin, Cout, K_pad, compute_itemsize, budget):
    """Largest divisor of D whose flattened block is lane-tile friendly,
    fits the VMEM budget, and keeps >= 2 grid steps (v7x megacore)."""
    hw = H * W
    divisors = [d for d in range(1, D + 1) if D % d == 0]
    aligned = [d for d in divisors if (d * hw) % 128 == 0]
    pool = aligned if aligned else divisors
    fitting = [d for d in pool
               if _vmem_bytes_per_step(d * hw, Cin, Cout, K_pad,
                                       compute_itemsize) <= budget]
    if not fitting:
        return min(pool)
    multi = [d for d in fitting if N * (D // d) >= 2]
    return max(multi) if multi else max(fitting)


def branch_block_2d_pallas(x_ncdhw, weight_oihw, bias, alpha, *,
                           d_block=None, compute_dtype=jnp.float32):
    """x_ncdhw: (N, Cin, D, H, W); weight_oihw: (Cout, Cin, 1, 3, 3);
    bias: (Cout,); alpha: scalar.  Returns (N, Cout, D, H, W) float32.

    compute_dtype=jnp.bfloat16 selects the bf16 MXU/col path (v6e/v7x);
    tolerance vs the f32 reference must be loosened in that case."""
    N, Cin, D, H, W = x_ncdhw.shape
    Cout = weight_oihw.shape[0]
    HW = H * W

    itemsize = jnp.dtype(compute_dtype).itemsize
    sub = 8 if itemsize == 4 else 16
    K = 9 * Cin + 1                      # conv taps + bias row
    K_pad = ((K + sub - 1) // sub) * sub

    cap = _vmem_capacity_bytes()
    budget = int(cap * 0.7)
    if d_block is None:
        d_block = _pick_d_block(N, D, H, W, Cin, Cout, K_pad, itemsize, budget)
    assert D % d_block == 0
    L_blk = d_block * HW

    # Free, contiguous reshape only: no transpose or pad passes in HBM.
    x_flat = x_ncdhw.reshape(N, Cin, D * HW).astype(jnp.float32)

    # (Cout, Cin, 1, 3, 3) -> (Cout, 9*Cin), column order (kh, kw, ci), with the
    # bias folded in as one extra K column (matched by the ones row in col).
    wmat = jnp.transpose(weight_oihw[:, :, 0, :, :], (0, 2, 3, 1))
    wmat = wmat.reshape(Cout, 9 * Cin).astype(jnp.float32)
    w_full = jnp.zeros((Cout, K_pad), jnp.float32)
    w_full = w_full.at[:, :9 * Cin].set(wmat)
    w_full = w_full.at[:, 9 * Cin].set(bias.astype(jnp.float32))
    w_full = w_full.astype(compute_dtype)

    masks = _build_boundary_masks(H, W, L_blk)
    a1 = jnp.asarray(alpha, jnp.float32).reshape(1)

    peak = _vmem_bytes_per_step(L_blk, Cin, Cout, K_pad, itemsize)
    vmem_limit = min(int(cap * 0.9), max(32 << 20, int(1.5 * peak)))

    kernel = functools.partial(_conv3x3_prelu_kernel, W=W)

    out = pl.pallas_call(
        kernel,
        out_shape=jax.ShapeDtypeStruct((N, Cout, D * HW), jnp.float32),
        grid_spec=pltpu.PrefetchScalarGridSpec(
            num_scalar_prefetch=0,
            grid=(N, D // d_block),
            in_specs=[
                pl.BlockSpec((1, Cin, L_blk), lambda n, db: (n, 0, db)),
                pl.BlockSpec((Cout, K_pad), lambda n, db: (0, 0)),
                pl.BlockSpec((9, L_blk), lambda n, db: (0, 0)),
                pl.BlockSpec(memory_space=pltpu.MemorySpace.SMEM),
            ],
            out_specs=pl.BlockSpec((1, Cout, L_blk), lambda n, db: (n, 0, db)),
            scratch_shapes=[pltpu.VMEM((K_pad, L_blk), compute_dtype)],
        ),
        compiler_params=pltpu.CompilerParams(
            dimension_semantics=("parallel", "parallel"),
            vmem_limit_bytes=vmem_limit,
        ),
    )(x_flat, w_full, masks, a1)

    return out.reshape(N, Cout, D, H, W)


def _reference(x_ncdhw, weight_oihw, bias, alpha):
    """Plain-JAX reference: per-depth-slice 2D conv + PReLU."""
    N, Cin, D, H, W = x_ncdhw.shape
    Cout = weight_oihw.shape[0]
    x2 = x_ncdhw.transpose(0, 2, 1, 3, 4).reshape(N * D, Cin, H, W)
    w2 = weight_oihw[:, :, 0, :, :]  # (Cout, Cin, 3, 3)
    y = lax.conv_general_dilated(
        x2, w2, window_strides=(1, 1), padding=((1, 1), (1, 1)),
        dimension_numbers=("NCHW", "OIHW", "NCHW"),
    )
    y = y + bias.reshape(1, Cout, 1, 1)
    y = jnp.where(y >= 0, y, alpha * y)
    y = y.reshape(N, D, Cout, H, W).transpose(0, 2, 1, 3, 4)
    return y


if __name__ == "__main__":
    # Small, deterministic setup consistent with the module's forward.
    N, Cin, Cout, D, H, W = 2, 8, 8, 2, 16, 16

    key = jax.random.PRNGKey(0)
    kx, kw, kb = jax.random.split(key, 3)

    x = jax.random.normal(kx, (N, Cin, D, H, W), dtype=jnp.float32)
    # Deterministic parameter init (synthetic; not a checkpoint load).
    fan_in = Cin * 1 * 3 * 3
    bound = 1.0 / (fan_in ** 0.5)
    weight = jax.random.uniform(
        kw, (Cout, Cin, 1, 3, 3), minval=-bound, maxval=bound, dtype=jnp.float32
    )
    bias = jax.random.uniform(
        kb, (Cout,), minval=-bound, maxval=bound, dtype=jnp.float32
    )
    alpha = jnp.float32(0.25)  # nn.PReLU() default init

    out = branch_block_2d_pallas(x, weight, bias, alpha)
    out = jax.block_until_ready(out)

    ref = jax.block_until_ready(_reference(x, weight, bias, alpha))
    assert out.shape == (N, Cout, D, H, W)
    assert jnp.allclose(out, ref, atol=2e-4, rtol=2e-4), "mismatch vs reference"

    print("KERNEL_OK")
</pallas_src>

<mosaic_0001>
module attributes {stable_mosaic.version = 11 : i64} {
  func.func @_conv3x3_prelu_kernel(%arg0: i32, %arg1: i32, %arg2: memref<1x8x512xf32, #tpu.memory_space<vmem>>, %arg3: memref<8x80xf32, #tpu.memory_space<vmem>>, %arg4: memref<9x512xf32, #tpu.memory_space<vmem>>, %arg5: memref<1xf32, #tpu.memory_space<smem>>, %arg6: memref<1x8x512xf32, #tpu.memory_space<vmem>>, %arg7: memref<80x512xf32, #tpu.memory_space<vmem>>) attributes {dimension_semantics = [#tpu.dimension_semantics<parallel>, #tpu.dimension_semantics<parallel>], iteration_bounds = array<i64: 2, 1>, scalar_prefetch = 0 : i64, scratch_operands = 1 : i64, tpu.core_type = #tpu.core_type<tc>, window_params = [{transform_indices = @transform_0, window_bounds = array<i64: 1, 8, 512>}, {pipeline_mode = #tpu.pipeline_mode<synchronous>, transform_indices = @transform_1, window_bounds = array<i64: 8, 80>}, {pipeline_mode = #tpu.pipeline_mode<synchronous>, transform_indices = @transform_2, window_bounds = array<i64: 9, 512>}, {transform_indices = @transform_3, window_bounds = array<i64: 1>}, {transform_indices = @transform_4, window_bounds = array<i64: 1, 8, 512>}]} {
    %c0 = arith.constant 0 : index
    %c0_0 = arith.constant 0 : index
    %c0_1 = arith.constant 0 : index
    %0 = vector.load %arg2[%c0, %c0_0, %c0_1] : memref<1x8x512xf32, #tpu.memory_space<vmem>>, vector<1x8x512xf32>
    %1 = vector.shape_cast %0 : vector<1x8x512xf32> to vector<8x512xf32>
    %c17_i32 = arith.constant 17 : i32
    %2 = tpu.dynamic_rotate %1 by %c17_i32 dim 1 : vector<8x512xf32>, i32 -> vector<8x512xf32>
    %c0_2 = arith.constant 0 : index
    %c0_3 = arith.constant 0 : index
    %3 = vector.load %arg4[%c0_2, %c0_3] : memref<9x512xf32, #tpu.memory_space<vmem>>, vector<1x512xf32>
    %4 = vector.broadcast %3 : vector<1x512xf32> to vector<8x512xf32>
    %5 = arith.mulf %2, %4 : vector<8x512xf32>
    %c0_4 = arith.constant 0 : index
    %c0_5 = arith.constant 0 : index
    %6 = vector.load %arg7[%c0_4, %c0_5] : memref<80x512xf32, #tpu.memory_space<vmem>>, vector<8x512xf32>
    tpu.vector_store %arg7[%c0_4, %c0_5], %5 {strides = array<i32>} : memref<80x512xf32, #tpu.memory_space<vmem>>, vector<8x512xf32>,
    %c16_i32 = arith.constant 16 : i32
    %7 = tpu.dynamic_rotate %1 by %c16_i32 dim 1 : vector<8x512xf32>, i32 -> vector<8x512xf32>
    %c1 = arith.constant 1 : index
    %c0_6 = arith.constant 0 : index
    %8 = vector.load %arg4[%c1, %c0_6] : memref<9x512xf32, #tpu.memory_space<vmem>>, vector<1x512xf32>
    %9 = vector.broadcast %8 : vector<1x512xf32> to vector<8x512xf32>
    %10 = arith.mulf %7, %9 : vector<8x512xf32>
    %c8 = arith.constant 8 : index
    %c0_7 = arith.constant 0 : index
    %11 = vector.load %arg7[%c8, %c0_7] : memref<80x512xf32, #tpu.memory_space<vmem>>, vector<8x512xf32>
    tpu.vector_store %arg7[%c8, %c0_7], %10 {strides = array<i32>} : memref<80x512xf32, #tpu.memory_space<vmem>>, vector<8x512xf32>,
    %c15_i32 = arith.constant 15 : i32
    %12 = tpu.dynamic_rotate %1 by %c15_i32 dim 1 : vector<8x512xf32>, i32 -> vector<8x512xf32>
    %c2 = arith.constant 2 : index
    %c0_8 = arith.constant 0 : index
    %13 = vector.load %arg4[%c2, %c0_8] : memref<9x512xf32, #tpu.memory_space<vmem>>, vector<1x512xf32>
    %14 = vector.broadcast %13 : vector<1x512xf32> to vector<8x512xf32>
    %15 = arith.mulf %12, %14 : vector<8x512xf32>
    %c16 = arith.constant 16 : index
    %c0_9 = arith.constant 0 : index
    %16 = vector.load %arg7[%c16, %c0_9] : memref<80x512xf32, #tpu.memory_space<vmem>>, vector<8x512xf32>
    tpu.vector_store %arg7[%c16, %c0_9], %15 {strides = array<i32>} : memref<80x512xf32, #tpu.memory_space<vmem>>, vector<8x512xf32>,
    %c1_i32 = arith.constant 1 : i32
    %17 = tpu.dynamic_rotate %1 by %c1_i32 dim 1 : vector<8x512xf32>, i32 -> vector<8x512xf32>
    %c3 = arith.constant 3 : index
    %c0_10 = arith.constant 0 : index
    %18 = vector.load %arg4[%c3, %c0_10] : memref<9x512xf32, #tpu.memory_space<vmem>>, vector<1x512xf32>
    %19 = vector.broadcast %18 : vector<1x512xf32> to vector<8x512xf32>
    %20 = arith.mulf %17, %19 : vector<8x512xf32>
    %c24 = arith.constant 24 : index
    %c0_11 = arith.constant 0 : index
    %21 = vector.load %arg7[%c24, %c0_11] : memref<80x512xf32, #tpu.memory_space<vmem>>, vector<8x512xf32>
    tpu.vector_store %arg7[%c24, %c0_11], %20 {strides = array<i32>} : memref<80x512xf32, #tpu.memory_space<vmem>>, vector<8x512xf32>,
    %c32 = arith.constant 32 : index
    %c0_12 = arith.constant 0 : index
    %22 = vector.load %arg7[%c32, %c0_12] : memref<80x512xf32, #tpu.memory_space<vmem>>, vector<8x512xf32>
    tpu.vector_store %arg7[%c32, %c0_12], %1 {strides = array<i32>} : memref<80x512xf32, #tpu.memory_space<vmem>>, vector<8x512xf32>,
    %c511_i32 = arith.constant 511 : i32
    %23 = tpu.dynamic_rotate %1 by %c511_i32 dim 1 : vector<8x512xf32>, i32 -> vector<8x512xf32>
    %c5 = arith.constant 5 : index
    %c0_13 = arith.constant 0 : index
    %24 = vector.load %arg4[%c5, %c0_13] : memref<9x512xf32, #tpu.memory_space<vmem>>, vector<1x512xf32>
    %25 = vector.broadcast %24 : vector<1x512xf32> to vector<8x512xf32>
    %26 = arith.mulf %23, %25 : vector<8x512xf32>
    %c40 = arith.constant 40 : index
    %c0_14 = arith.constant 0 : index
    %27 = vector.load %arg7[%c40, %c0_14] : memref<80x512xf32, #tpu.memory_space<vmem>>, vector<8x512xf32>
    tpu.vector_store %arg7[%c40, %c0_14], %26 {strides = array<i32>} : memref<80x512xf32, #tpu.memory_space<vmem>>, vector<8x512xf32>,
    %c497_i32 = arith.constant 497 : i32
    %28 = tpu.dynamic_rotate %1 by %c497_i32 dim 1 : vector<8x512xf32>, i32 -> vector<8x512xf32>
    %c6 = arith.constant 6 : index
    %c0_15 = arith.constant 0 : index
    %29 = vector.load %arg4[%c6, %c0_15] : memref<9x512xf32, #tpu.memory_space<vmem>>, vector<1x512xf32>
    %30 = vector.broadcast %29 : vector<1x512xf32> to vector<8x512xf32>
    %31 = arith.mulf %28, %30 : vector<8x512xf32>
    %c48 = arith.constant 48 : index
    %c0_16 = arith.constant 0 : index
    %32 = vector.load %arg7[%c48, %c0_16] : memref<80x512xf32, #tpu.memory_space<vmem>>, vector<8x512xf32>
    tpu.vector_store %arg7[%c48, %c0_16], %31 {strides = array<i32>} : memref<80x512xf32, #tpu.memory_space<vmem>>, vector<8x512xf32>,
    %c496_i32 = arith.constant 496 : i32
    %33 = tpu.dynamic_rotate %1 by %c496_i32 dim 1 : vector<8x512xf32>, i32 -> vector<8x512xf32>
    %c7 = arith.constant 7 : index
    %c0_17 = arith.constant 0 : index
    %34 = vector.load %arg4[%c7, %c0_17] : memref<9x512xf32, #tpu.memory_space<vmem>>, vector<1x512xf32>
    %35 = vector.broadcast %34 : vector<1x512xf32> to vector<8x512xf32>
    %36 = arith.mulf %33, %35 : vector<8x512xf32>
    %c56 = arith.constant 56 : index
    %c0_18 = arith.constant 0 : index
    %37 = vector.load %arg7[%c56, %c0_18] : memref<80x512xf32, #tpu.memory_space<vmem>>, vector<8x512xf32>
    tpu.vector_store %arg7[%c56, %c0_18], %36 {strides = array<i32>} : memref<80x512xf32, #tpu.memory_space<vmem>>, vector<8x512xf32>,
    %c495_i32 = arith.constant 495 : i32
    %38 = tpu.dynamic_rotate %1 by %c495_i32 dim 1 : vector<8x512xf32>, i32 -> vector<8x512xf32>
    %c8_19 = arith.constant 8 : index
    %c0_20 = arith.constant 0 : index
    %39 = vector.load %arg4[%c8_19, %c0_20] : memref<9x512xf32, #tpu.memory_space<vmem>>, vector<1x512xf32>
    %40 = vector.broadcast %39 : vector<1x512xf32> to vector<8x512xf32>
    %41 = arith.mulf %38, %40 : vector<8x512xf32>
    %c64 = arith.constant 64 : index
    %c0_21 = arith.constant 0 : index
    %42 = vector.load %arg7[%c64, %c0_21] : memref<80x512xf32, #tpu.memory_space<vmem>>, vector<8x512xf32>
    tpu.vector_store %arg7[%c64, %c0_21], %41 {strides = array<i32>} : memref<80x512xf32, #tpu.memory_space<vmem>>, vector<8x512xf32>,
    %43 = tpu.iota {dimensions = array<i32: 0>} : vector<8x512xi32>
    %c0_i32 = arith.constant 0 : i32
    %44 = vector.broadcast %c0_i32 : i32 to vector<8x512xi32>
    %45 = arith.cmpi eq, %43, %44 : vector<8x512xi32>
    %cst = arith.constant 1.000000e+00 : f32
    %cst_22 = arith.constant 0.000000e+00 : f32
    %46 = vector.broadcast %cst : f32 to vector<8x512xf32>
    %47 = vector.broadcast %cst_22 : f32 to vector<8x512xf32>
    %48 = arith.select %45, %46, %47 : vector<8x512xi1>, vector<8x512xf32>
    %c72 = arith.constant 72 : index
    %c0_23 = arith.constant 0 : index
    %49 = vector.load %arg7[%c72, %c0_23] : memref<80x512xf32, #tpu.memory_space<vmem>>, vector<8x512xf32>
    tpu.vector_store %arg7[%c72, %c0_23], %48 {strides = array<i32>} : memref<80x512xf32, #tpu.memory_space<vmem>>, vector<8x512xf32>,
    %c0_24 = arith.constant 0 : index
    %c0_25 = arith.constant 0 : index
    %50 = vector.load %arg3[%c0_24, %c0_25] : memref<8x80xf32, #tpu.memory_space<vmem>>, vector<8x80xf32>
    %c0_26 = arith.constant 0 : index
    %c0_27 = arith.constant 0 : index
    %51 = vector.load %arg7[%c0_26, %c0_27] : memref<80x512xf32, #tpu.memory_space<vmem>>, vector<80x512xf32>
    %cst_28 = arith.constant dense<0.000000e+00> : vector<8x512xf32>
    %52 = tpu.matmul %50, %51, %cst_28 {dimension_numbers = #tpu.dot_dimension_numbers<[1], [0], [0], [1], [0, 0, 1, 1], [], []>} : vector<8x80xf32>, vector<80x512xf32>, vector<8x512xf32> -> vector<8x512xf32>
    %c0_29 = arith.constant 0 : index
    %53 = memref.load %arg5[%c0_29] : memref<1xf32, #tpu.memory_space<smem>>
    %cst_30 = arith.constant 0.000000e+00 : f32
    %54 = vector.broadcast %cst_30 : f32 to vector<8x512xf32>
    %55 = arith.cmpf oge, %52, %54 : vector<8x512xf32>
    %56 = vector.broadcast %53 : f32 to vector<8x512xf32>
    %57 = arith.mulf %56, %52 : vector<8x512xf32>
    %58 = arith.select %55, %52, %57 : vector<8x512xi1>, vector<8x512xf32>
    %c0_31 = arith.constant 0 : index
    %c0_32 = arith.constant 0 : index
    %c0_33 = arith.constant 0 : index
    %59 = vector.load %arg6[%c0_31, %c0_32, %c0_33] : memref<1x8x512xf32, #tpu.memory_space<vmem>>, vector<1x8x512xf32>
    %60 = vector.shape_cast %59 : vector<1x8x512xf32> to vector<8x512xf32>
    %61 = vector.shape_cast %58 : vector<8x512xf32> to vector<1x8x512xf32>
    tpu.vector_store %arg6[%c0_31, %c0_32, %c0_33], %61 {strides = array<i32>} : memref<1x8x512xf32, #tpu.memory_space<vmem>>, vector<1x8x512xf32>,
    return
  }
  func.func @transform_0(%arg0: i32, %arg1: i32) -> (i32, i32, i32) {
    %c0_i32 = arith.constant 0 : i32
    %c0_i32_0 = arith.constant 0 : i32
    return %arg0, %c0_i32, %arg1 : i32, i32, i32
  }
  func.func @transform_1(%arg0: i32, %arg1: i32) -> (i32, i32) {
    %c0_i32 = arith.constant 0 : i32
    %c0_i32_0 = arith.constant 0 : i32
    %c0_i32_1 = arith.constant 0 : i32
    return %c0_i32, %c0_i32_0 : i32, i32
  }
  func.func @transform_2(%arg0: i32, %arg1: i32) -> (i32, i32) {
    %c0_i32 = arith.constant 0 : i32
    %c0_i32_0 = arith.constant 0 : i32
    %c0_i32_1 = arith.constant 0 : i32
    return %c0_i32, %c0_i32_0 : i32, i32
  }
  func.func @transform_3(%arg0: i32, %arg1: i32) -> i32 {
    %c0_i32 = arith.constant 0 : i32
    %c0_i32_0 = arith.constant 0 : i32
    return %c0_i32 : i32
  }
  func.func @transform_4(%arg0: i32, %arg1: i32) -> (i32, i32, i32) {
    %c0_i32 = arith.constant 0 : i32
    %c0_i32_0 = arith.constant 0 : i32
    return %arg0, %c0_i32, %arg1 : i32, i32, i32
  }
}

</mosaic_0001>

<bundles_post_ra>
// kernel: tpu_custom_call.1
= control target key start
LH: loop header
LB: loop body
LE: loop exit
PB: predicated region body
PF: predicated region fallthrough
CT: control target
= control target key end

     0   :  { %s1480_s0 = inlined_call_operand.hbm [shape: f32[2,8,512], index: 0, kind: input, shape index: {}]   ;;  %s1481_s1 = inlined_call_operand.hbm [shape: f32[8,80], index: 1, kind: input, shape index: {}]   ;;  %s1482_s2 = inlined_call_operand.hbm [shape: f32[9,512], index: 2, kind: input, shape index: {}]   ;;  %s1483_s3 = inlined_call_operand.<no memory space> [shape: f32[1], index: 3, kind: input, shape index: {}]   ;;  %s1484_s4 = inlined_call_operand.hbm [shape: f32[2,8,512], index: 4, kind: output, shape index: {}]  }
   0x1   :  { %9 = sst [smem:[#allocation3]] %s1483_s3 }
   0x2   :  { %10 = vsyncpa [#allocation5], 0 }
   0x3   :  { %12 = vsyncpa [#allocation5 + $0x1], 0 }
   0x4   :  { %13 = vsyncpa [#allocation8], 0 }
   0x5   :  { %14 = vsyncpa [#allocation6], 0 }
   0x6   :  { %16 = vsyncpa [#allocation6 + $0x1], 0  ;;  %s1148_s17 = smov 0   ;;  %s1150_s18 = smov 0  }
   0x7   :  { %s1152_s19 = smov 0   ;;  %s1154_s20 = smov 0  }
   0x8   :  { %s1156_s21 = smov 0   ;;  %s1158_s22 = smov 0  }
   0x9 LB: > { %s806_s3 = sadd.s32 4294967295, %s1105_s22   ;;  %s807_s23 = sadd.s32 4294967294, %s1105_s22   ;;  %s1105_s22 = sphi %s1158_s22, %s22_s22   ;;  %s1101_s21 = sphi %s1156_s21, %s1494_s21   ;;  %s1097_s20 = sphi %s1154_s20, %s1493_s20   ;;  %s1093_s19 = sphi %s1152_s19, %s1492_s19   ;;  %s1089_s18 = sphi %s1150_s18, %s1491_s18   ;;  %s1085_s17 = sphi %s1148_s17, %s1490_s17  }
   0xa   : > { %p56_p0 = scmp.ne.s32.totalorder %s1089_s18, %s1085_s17  ;;  %p1184_p1 = scmp.eq.s32.totalorder %s806_s3, 0 }
   0xb   : > { %p151_p2 = scmp.eq.s32.totalorder %s807_s23, 1  ;;  %p808_p4 = scmp.ge.s32.totalorder %s1105_s22, 1 }
   0xc   : > { %p1190_p3 = por %p1184_p1, %p56_p0  ;;  %p158_p6 = scmp.lt.s32.totalorder %s1105_s22, 3 }
   0xd   : > { %p1195_p5 = por %p151_p2, %p56_p0  ;;  %s170_s29 = sshll.u32 %s1481_s1, 4  ;;  %s171_s29 = int_to_ptr.hbm [resolvable:$true] %s170_s29 }
   0xe   : > { %p1203_p7 = pnand %p808_p4, %p158_p6  ;;  %p811_p8 = scmp.ge.s32.totalorder %s1105_s22, 2 }
   0xf   : > { %s1107_s5 = smov [#allocation7]   ;;  %s181_s9 = sshll.u32 %s1482_s2, 4  ;;  %s182_s9 = int_to_ptr.hbm [resolvable:$true] %s181_s9 }
  0x10   : > { %p847_p9 = pneg %p1203_p7  ;;  %s172_s6 = sshll.u32 %s1107_s5, 4  ;;  %s173_s6 = int_to_ptr.vmem [resolvable:$true] %s172_s6 }
  0x11   : > { %s1108_s10 = smov [#allocation9]   ;;  %s1109_s12 = smov 512  }
  0x12   : > { %p848_p10 = pnand %p847_p9, %p1184_p1  ;;  %s183_s11 = sshll.u32 %s1108_s10, 4  ;;  %s184_s11 = int_to_ptr.vmem [resolvable:$true] %s183_s11 }
  0x13   : > { %s1110_s13 = smov 32   ;;  %p145_p11 = scmp.eq.s32.totalorder %s806_s3, 1 }
  0x14   : > { %850 = dma.hbm_to_vmem [thread:$0]  (!%p848_p10), %s171_s29, 128, %s173_s6, [#allocation8]  }
  0x15   : > { %853 = dma.hbm_to_vmem [thread:$0]  (!%p848_p10), %s182_s9, 1024, %s184_s11, [#allocation8], %s1109_s12, %s1109_s12, %s1110_s13  }
  0x16   : > { %s34_s14 = sadd.s32 1, %s1101_s21  ;;  %s43_s15 = sadd.s32 1, %s1093_s19 }
  0x17   : > { %p36_p12 = scmp.ge.s32.totalorder %s34_s14, 2  ;;  %p50_p13 = scmp.ne.s32.totalorder %s1093_s19, %s1089_s18 }
  0x18   : > { %p51_p0 = scmp.eq.s32.totalorder %s1105_s22, 0  ;;  %p864_p4 = scmp.lt.s32.totalorder %s1105_s22, 2 }
  0x19   : > { %s1496_s14 = smov (%p36_p12, %s34_s14), 0  ;;  %p1224_p2 = por %p145_p11, %p50_p13 }
  0x1a   : > { %s38_s23 = ssub.s32 %s1101_s21, %s1496_s14  ;;  %s200_s27 = sand.u32 1, %s1093_s19  }
  0x1b   : > { %p41_p6 = scmp.eq.s32.totalorder %s38_s23, 0  ;;  %p52_p9 = por %p51_p0, %p50_p13 }
  0x1c   : > { %s812_s28 = sshll.u32 %s200_s27, 5  ;;  %s829_s3 = sshll.u32 %s1101_s21, 5 }
  0x1d   : > { %s1234_s29 = scalar_select %p41_p6, %s1093_s19, %s43_s15  }
  0x1e   : > { %s211_s7 = scalar_lea.hbm %s1480_s0, %s829_s3  ;;  %s204_s9 = scalar_lea.vmem [#allocation4], %s812_s28 }
  0x1f   : > { %s213_s8 = sshll.u32 %s211_s7, 4  ;;  %s215_s10 = sshll.u32 %s204_s9, 4  ;;  %s214_s8 = int_to_ptr.hbm [resolvable:$true] %s213_s8  ;;  %s216_s10 = int_to_ptr.vmem [resolvable:$true] %s215_s10 }
  0x20   : > { %p855_p10 = pnand %p864_p4, %p52_p9  ;;  %s201_s11 = scalar_lea.sflag [#allocation5], %s200_s27 }
  0x21   : > { %224 = sbr.rel (%p1203_p7) target bundleno = 377 (0x179), region = 36  ;;  %s1244_s12 = sand.u32 (!%p1203_p7), 1, %s1089_s18  }
  0x22   : > { %857 = dma.hbm_to_vmem [thread:$0]  (!%p855_p10), %s214_s8, 512, %s216_s10, %s201_s11  }
  0x23   : > { %s816_s13 = sshll.u32 (!%p1203_p7), %s1244_s12, 5  ;;  %s227_s15 = scalar_lea.sflag (!%p1203_p7), [#allocation5], %s1244_s12 }
  0x24   : > { %s230_s23 = scalar_lea.vmem (!%p1203_p7), [#allocation4], %s816_s13 }
  0x26   : > { %1072 = dma.done.wait (%p1190_p3), %s227_s15, 512  }
  0x27   : > { %1074 = vsyncadd (%p1190_p3), %s227_s15, 4294966784 }
  0x28   : > { %1076 = dma.done.wait (%p1184_p1), [#allocation8], 1152  }
  0x29   : > { %1078 = vsyncadd (%p1184_p1), [#allocation8], 4294966144  ;;  %v1258_v0 = vld [vmem:[%s230_s23 + $0x18] sm:$0xff]  ;;  %v1260_v1 = vld [vmem:[%s230_s23 + $0x10] sm:$0xff]  ;;  %s1111_s30 = smov 111   ;;  %s1112_s27 = smov 112   ;;  %v280_v4 = vlaneseq }
  0x2a   : > { %v1262_v2 = vld [vmem:[%s230_s23] sm:$0xff]  ;;  %507 = vrot.lane.b32.xlu1 %v1258_v0, %s1111_s30  ;;  %473 = vrot.lane.b32.xlu2 %v1260_v1, %s1112_s27  ;;  %s1113_s24 = smov 113   ;;  %s1114_s25 = smov 127   ;;  %v1276_v3 = vld [vmem:[%s230_s23 + $0x8] sm:$0xff]  ;;  %v1119_v6 = vmov 1.0   ;;  %vm582_vm9 = vcmask 654336  }
  0x2b   : > { %501 = vrot.lane.b32.xlu0 %v1262_v2, %s1111_s30  ;;  %s1115_s28 = smov 1   ;;  %s1116_s3 = smov 15   ;;  %v534_v5 = vshrl.u32 %v280_v4, 7  ;;  %v1300_v9 = vand.u32 127, %v280_v4 }
  0x2c   : > { %s1117_s5 = smov 16   ;;  %s1118_s6 = smov 17   ;;  %v1302_v10 = vld [vmem:[#allocation9 + $0x20] ss:$8 sm:$0xf] }
  0x2d   : > { %vm535_vm0 = vcmp.eq.s32.totalorder %v534_v5, 0  ;;  %vm509_vm1 = vcmp.lt.s32.totalorder %v1300_v9, 111  ;;  %v520_v11 = vperm.slane %v1302_v10, 3  ;;  %v1308_v17 = vld [vmem:[#allocation9 + $0x7] ss:$8 sm:$0xf] }
  0x2e   : > { %834 = vmatpush.msk.msra.mxu3 %vm535_vm0, %v1119_v6  ;;  %833 = vmatpush.msk.msra.mxu2 %vm535_vm0, %v1119_v6  ;;  %v488_v18 = vperm.slane %v1308_v17, 3  ;;  %vm477_vm2 = vcmp.lt.s32.totalorder %v1300_v9, 112  ;;  %v519_v19 = vperm.slane %v1302_v10, 2  ;;  %v487_v23 = vperm.slane %v1308_v17, 2  ;;  %s666_s7 = sld [smem:[#allocation3]]  ;;  %s265_s8 = scalar_lea.vmem [#allocation10], %s816_s13 }
  0x2f   : > { %831 = vmatpush.msk.msra.mxu0 %vm535_vm0, %v1119_v6  ;;  %832 = vmatpush.msk.msra.mxu1 %vm535_vm0, %v1119_v6  ;;  %v451_v29 = vld [vmem:[#allocation9 + $0x6] ss:$8 sm:$0xf]  ;;  %vm445_vm3 = vcmp.lt.s32.totalorder %v1300_v9, 113  ;;  %vm413_vm4 = vcmp.lt.s32.totalorder %v1300_v9, 127  ;;  %v517_v50 = vperm.slane %v1302_v10, 0 }
  0x30   : > { %v455_v31 = vperm.slane %v451_v29, 2  ;;  %v456_v32 = vperm.slane %v451_v29, 3  ;;  %v1328_v40 = vld [vmem:[#allocation9 + $0x5] ss:$8 sm:$0xf]  ;;  %v518_v51 = vperm.slane %v1302_v10, 1 }
  0x31   : > { %v423_v41 = vperm.slane %v1328_v40, 2  ;;  %v424_v42 = vperm.slane %v1328_v40, 3  ;;  %v485_v54 = vperm.slane %v1308_v17, 0  ;;  %v486_v55 = vperm.slane %v1308_v17, 1  ;;  %s830_s9 = sshll.u32 %s1097_s20, 5  ;;  %s700_s23 = sshll.u32 %s265_s8, 4  ;;  %s701_s23 = int_to_ptr.vmem [resolvable:$true] %s700_s23 }
  0x32   : > { %475 = vrot.lane.b32.xlu2 %v1258_v0, %s1112_s27  ;;  %469 = vrot.lane.b32.xlu1 %v1262_v2, %s1112_s27  ;;  %v453_v62 = vperm.slane %v451_v29, 0  ;;  %v454_v63 = vperm.slane %v451_v29, 1  ;;  %v1362_v4 = vld [vmem:[#allocation9 + $0x3] ss:$8 sm:$0xf]  ;;  %vm377_vm5 = vcmp.lt.s32.totalorder %v1300_v9, 1  ;;  %s698_s15 = scalar_lea.hbm %s1484_s4, %s830_s9 }
  0x33   : > { %505 = vrot.lane.b32.xlu0 %v1260_v1, %s1111_s30  ;;  %v387_v10 = vperm.slane %v1362_v4, 2  ;;  %vm345_vm6 = vcmp.lt.s32.totalorder %v1300_v9, 15  ;;  %v1387_v29 = vld [vmem:[#allocation9 + $0x1] ss:$8 sm:$0xf]  ;;  %vm313_vm7 = vcmp.lt.s32.totalorder %v1300_v9, 16 }
  0x34   : > { %vm282_vm8 = vcmp.lt.s32.totalorder %v1300_v9, 17  ;;  %s685_s20 = scalar_lea.sflag [#allocation6], %s1244_s12 }
  0x3a   : > { %443 = vrot.lane.b32.xlu2 %v1258_v0, %s1113_s24  ;;  %441 = vrot.lane.b32.xlu1 %v1260_v1, %s1113_s24 }
  0x3b   : > { %437 = vrot.lane.b32.xlu0 %v1262_v2, %s1113_s24 }
  0x42   : > { %411 = vrot.lane.b32.xlu2 %v1258_v0, %s1114_s25  ;;  %409 = vrot.lane.b32.xlu1 %v1260_v1, %s1114_s25 }
  0x43   : > { %405 = vrot.lane.b32.xlu0 %v1262_v2, %s1114_s25 }
  0x4a   : > { %371 = vrot.lane.b32.xlu2 %v1276_v3, %s1115_s28  ;;  %471 = vrot.lane.b32.xlu1 %v1276_v3, %s1112_s27 }
  0x4b   : > { %503 = vrot.lane.b32.xlu0 %v1276_v3, %s1111_s30  ;;  %s702_s30 = sshll.u32 %s698_s15, 4  ;;  %s703_s30 = int_to_ptr.hbm [resolvable:$true] %s702_s30 }
  0x4c   : > { %s1033_s13 = sshra.s32 %s703_s30, 4  ;;  %s1034_s13 = int_to_ptr.hbm [resolvable:$true] %s1033_s13 }
  0x4d   : > { %s1035_s27 = scalar_lea.hbm %s1034_s13, 32  ;;  %p1040_p11 = scmp.lt.s32.totalorder %s1034_s13, %s1484_s4 }
  0x4e   : > { %p1036_p1 = scmp.ne.s32.totalorder %s1034_s13, %s1035_s27 }
  0x50   : > { %p1037_p3 = pnand %p1036_p1, %p1224_p2 }
  0x52   : > { %439 = vrot.lane.b32.xlu2 %v1276_v3, %s1113_s24  ;;  %375 = vrot.lane.b32.xlu1 %v1258_v0, %s1115_s28  ;;  %p1038_p7 = pneg %p1037_p3 }
  0x53   : > { %373 = vrot.lane.b32.xlu0 %v1260_v1, %s1115_s28 }
  0x5a   : > { %343 = vrot.lane.b32.xlu2 %v1258_v0, %s1116_s3  ;;  %341 = vrot.lane.b32.xlu1 %v1260_v1, %s1116_s3 }
  0x5b   : > { %339 = vrot.lane.b32.xlu0 %v1276_v3, %s1116_s3 }
  0x62   : > { %309 = vrot.lane.b32.xlu2 %v1260_v1, %s1117_s5  ;;  %307 = vrot.lane.b32.xlu1 %v1276_v3, %s1117_s5 }
  0x63   : > { %407 = vrot.lane.b32.xlu0 %v1276_v3, %s1114_s25 }
  0x6a   : > { %276 = vrot.lane.b32.xlu2 %v1260_v1, %s1118_s6  ;;  %274 = vrot.lane.b32.xlu1 %v1276_v3, %s1118_s6 }
  0x6b   : > { %311 = vrot.lane.b32.xlu0 %v1258_v0, %s1117_s5 }
  0x72   : > { %337 = vrot.lane.b32.xlu2 %v1262_v2, %s1116_s3  ;;  %369 = vrot.lane.b32.xlu1 %v1262_v2, %s1115_s28  ;;  %s1039_s28 = scalar_lea.hbm %s1484_s4, 64 }
  0x73   : > { %278 = vrot.lane.b32.xlu0 %v1258_v0, %s1118_s6  ;;  %p1041_p12 = scmp.lt.s32.totalorder %s1039_s28, %s1035_s27 }
  0x75   : > { %p1042_p13 = por %p1041_p12, %p1040_p11 }
  0x77   : > { %p1043_p0 = pnand %p1042_p13, %p1038_p7 }
  0x7a   : > { %272 = vrot.lane.b32.xlu1 %v1262_v2, %s1118_s6 }
  0x7b   : > { %305 = vrot.lane.b32.xlu0 %v1262_v2, %s1117_s5 }
  0x84   : > { %v1298_v7 = vpop.permute.xlu2 %473 }
  0x8c   : > { %v476_v8 = vpop.permute.xlu2 %475 }
  0x8d   : > { %v478_v24 = vsel %vm477_vm2, %v1298_v7, %v476_v8 }
  0x8e   : > { %v495_v30 = vmul.f32 %v487_v23, %v478_v24 }
  0x94   : > { %v444_v12 = vpop.permute.xlu2 %443 }
  0x9c   : > { %v508_v13 = vpop.permute.xlu1 %507  ;;  %v412_v25 = vpop.permute.xlu2 %411 }
  0x9d   : > { %v502_v14 = vpop.permute.xlu0 %501 }
  0x9e   : > { %v513_v15 = vsel %vm509_vm1, %v508_v13, %v502_v14 }
  0x9f   : > { %v528_v16 = vmul.f32 %v520_v11, %v513_v15  ;;  %v388_v11 = vperm.slane %v1362_v4, 3 }
  0xa1   : > { %653 = vmatpush.msra.mxu3 %v528_v16 }
  0xa4   : > { %v470_v20 = vpop.permute.xlu1 %469  ;;  %v1326_v39 = vpop.permute.xlu2 %371 }
  0xa5   : > { %v481_v21 = vsel %vm477_vm2, %v476_v8, %v470_v20  ;;  %v506_v22 = vpop.permute.xlu0 %505 }
  0xa6   : > { %v510_v26 = vsel %vm509_vm1, %v506_v22, %v508_v13  ;;  %v496_v27 = vmul.f32 %v488_v18, %v481_v21 }
  0xa7   : > { %v527_v28 = vmul.f32 %v519_v19, %v510_v26  ;;  %v1377_v19 = vld [vmem:[#allocation9 + $0x2] ss:$8 sm:$0xf] }
  0xa8   : > { %654 = vmatpush.msra.mxu3 %v496_v27  ;;  %v355_v21 = vperm.slane %v1377_v19, 2 }
  0xa9   : > { %633 = vmatpush.msra.mxu2 %v527_v28 }
  0xab   : > { %634 = vmatpush.msra.mxu2 %v495_v30  ;;  %v323_v30 = vperm.slane %v1387_v29, 2 }
  0xac   : > { %v442_v33 = vpop.permute.xlu1 %441  ;;  %v440_v49 = vpop.permute.xlu2 %439 }
  0xad   : > { %v446_v34 = vsel %vm445_vm3, %v442_v33, %v444_v12  ;;  %v438_v35 = vpop.permute.xlu0 %437 }
  0xae   : > { %v449_v36 = vsel %vm445_vm3, %v444_v12, %v438_v35  ;;  %v463_v37 = vmul.f32 %v455_v31, %v446_v34  ;;  %v421_v31 = vperm.slane %v1328_v40, 0 }
  0xaf   : > { %v464_v38 = vmul.f32 %v456_v32, %v449_v36  ;;  %v422_v32 = vperm.slane %v1328_v40, 1 }
  0xb0   : > { %635 = vmatpush.msra.mxu2 %v463_v37 }
  0xb1   : > { %655 = vmatpush.msra.mxu3 %v464_v38 }
  0xb4   : > { %v1333_v43 = vpop.permute.xlu1 %409  ;;  %v1367_v12 = vpop.permute.xlu2 %343 }
  0xb5   : > { %v414_v44 = vsel %vm413_vm4, %v1333_v43, %v412_v25  ;;  %v1338_v45 = vpop.permute.xlu0 %405 }
  0xb6   : > { %v417_v46 = vsel %vm413_vm4, %v412_v25, %v1338_v45  ;;  %v431_v47 = vmul.f32 %v423_v41, %v414_v44  ;;  %v287_v44 = vld [vmem:[#allocation9] ss:$8 sm:$0xf] }
  0xb7   : > { %v432_v48 = vmul.f32 %v424_v42, %v417_v46  ;;  %v291_v40 = vperm.slane %v287_v44, 2 }
  0xb8   : > { %636 = vmatpush.msra.mxu2 %v431_v47  ;;  %v324_v47 = vperm.slane %v1387_v29, 3 }
  0xb9   : > { %656 = vmatpush.msra.mxu3 %v432_v48 }
  0xba   : > { %637 = vmatpush.msra.mxu2 %v1260_v1  ;;  %v448_v1 = vsel %vm445_vm3, %v438_v35, %v440_v49 }
  0xbb   : > { %657 = vmatpush.msra.mxu3 %v1258_v0  ;;  %v447_v0 = vsel %vm445_vm3, %v440_v49, %v442_v33 }
  0xbc   : > { %v472_v52 = vpop.permute.xlu1 %471  ;;  %v462_v8 = vmul.f32 %v454_v63, %v447_v0  ;;  %v310_v25 = vpop.permute.xlu2 %309 }
  0xbd   : > { %v504_v53 = vpop.permute.xlu0 %503  ;;  %v479_v56 = vsel %vm477_vm2, %v472_v52, %v1298_v7  ;;  %v480_v57 = vsel %vm477_vm2, %v470_v20, %v472_v52  ;;  %v461_v7 = vmul.f32 %v453_v62, %v448_v1  ;;  %v356_v20 = vperm.slane %v1377_v19, 3 }
  0xbe   : > { %v511_v58 = vsel %vm509_vm1, %v504_v53, %v506_v22  ;;  %v512_v59 = vsel %vm509_vm1, %v502_v14, %v504_v53  ;;  %v493_v5 = vmul.f32 %v485_v54, %v480_v57  ;;  %v494_v6 = vmul.f32 %v486_v55, %v479_v56 }
  0xbf   : > { %v525_v60 = vmul.f32 %v517_v50, %v512_v59  ;;  %v526_v61 = vmul.f32 %v518_v51, %v511_v58  ;;  %v541_v51 = vld [vmem:[#allocation7] sm:$0xff]  ;;  %v292_v54 = vperm.slane %v287_v44, 3  ;;  %v353_v56 = vperm.slane %v1377_v19, 0 }
  0xc0   : > { %v354_v57 = vperm.slane %v1377_v19, 1 }
  0xc1   : > { %593 = vmatpush.msra.mxu0 %v525_v60  ;;  %613 = vmatpush.msra.mxu1 %v526_v61 }
  0xc3   : > { %594 = vmatpush.msra.mxu0 %v493_v5  ;;  %614 = vmatpush.msra.mxu1 %v494_v6 }
  0xc4   : > { %v1369_v13 = vpop.permute.xlu1 %375  ;;  %v277_v46 = vpop.permute.xlu2 %276 }
  0xc5   : > { %595 = vmatpush.msra.mxu0 %v461_v7  ;;  %615 = vmatpush.msra.mxu1 %v462_v8  ;;  %v374_v14 = vpop.permute.xlu0 %373  ;;  %v322_v7 = vperm.slane %v1387_v29, 1 }
  0xc6   : > { %v378_v15 = vsel %vm377_vm5, %v374_v14, %v1369_v13  ;;  %v379_v16 = vsel %vm377_vm5, %v1326_v39, %v374_v14 }
  0xc7   : > { %v395_v17 = vmul.f32 %v387_v10, %v379_v16  ;;  %v396_v18 = vmul.f32 %v388_v11, %v378_v15  ;;  %v289_v11 = vperm.slane %v287_v44, 0 }
  0xc9   : > { %638 = vmatpush.msra.mxu2 %v395_v17  ;;  %658 = vmatpush.msra.mxu3 %v396_v18 }
  0xcc   : > { %v342_v22 = vpop.permute.xlu1 %341  ;;  %v338_v53 = vpop.permute.xlu2 %337 }
  0xcd   : > { %v346_v23 = vsel %vm345_vm6, %v342_v22, %v1367_v12  ;;  %v340_v24 = vpop.permute.xlu0 %339  ;;  %v349_v58 = vsel %vm345_vm6, %v1367_v12, %v338_v53  ;;  %v290_v12 = vperm.slane %v287_v44, 1 }
  0xce   : > { %v347_v26 = vsel %vm345_vm6, %v340_v24, %v342_v22  ;;  %v364_v27 = vmul.f32 %v356_v20, %v346_v23  ;;  %v348_v59 = vsel %vm345_vm6, %v338_v53, %v340_v24  ;;  %v361_v5 = vmul.f32 %v353_v56, %v349_v58 }
  0xcf   : > { %v363_v28 = vmul.f32 %v355_v21, %v347_v26  ;;  %v362_v6 = vmul.f32 %v354_v57, %v348_v59  ;;  %v671_v21 = vstv %s666_s7 }
  0xd0   : > { %659 = vmatpush.msra.mxu3 %v364_v27 }
  0xd1   : > { %639 = vmatpush.msra.mxu2 %v363_v28 }
  0xd4   : > { %v308_v33 = vpop.permute.xlu1 %307 }
  0xd5   : > { %v315_v34 = vsel %vm313_vm7, %v308_v33, %v310_v25  ;;  %v408_v35 = vpop.permute.xlu0 %407 }
  0xd6   : > { %v415_v36 = vsel %vm413_vm4, %v408_v35, %v1333_v43  ;;  %v416_v37 = vsel %vm413_vm4, %v1338_v45, %v408_v35  ;;  %v331_v38 = vmul.f32 %v323_v30, %v315_v34 }
  0xd7   : > { %v429_v41 = vmul.f32 %v421_v31, %v416_v37  ;;  %v430_v42 = vmul.f32 %v422_v32, %v415_v36 }
  0xd8   : > { %640 = vmatpush.msra.mxu2 %v331_v38 }
  0xd9   : > { %596 = vmatpush.msra.mxu0 %v429_v41  ;;  %616 = vmatpush.msra.mxu1 %v430_v42 }
  0xdb   : > { %597 = vmatpush.msra.mxu0 %v1262_v2  ;;  %617 = vmatpush.msra.mxu1 %v1276_v3  ;;  %v385_v2 = vperm.slane %v1362_v4, 0  ;;  %v386_v3 = vperm.slane %v1362_v4, 1 }
  0xdc   : > { %v275_v43 = vpop.permute.xlu1 %274 }
  0xdd   : > { %v284_v45 = vsel %vm282_vm8, %v275_v43, %v277_v46  ;;  %v312_v48 = vpop.permute.xlu0 %311 }
  0xde   : > { %v314_v49 = vsel %vm313_vm7, %v310_v25, %v312_v48  ;;  %v299_v50 = vmul.f32 %v291_v40, %v284_v45 }
  0xdf   : > { %v332_v52 = vmul.f32 %v324_v47, %v314_v49 }
  0xe0   : > { %641 = vmatpush.msra.mxu2 %v299_v50 }
  0xe1   : > { %660 = vmatpush.msra.mxu3 %v332_v52  ;;  %822 = vmatmul.msk.f32.vlgmr.msra.gmra.mxu2 %vm582_vm9, %v541_v51 }
  0xe4   : > { %v370_v55 = vpop.permute.xlu1 %369 }
  0xe5   : > { %v380_v60 = vsel %vm377_vm5, %v370_v55, %v1326_v39  ;;  %v381_v61 = vsel %vm377_vm5, %v1369_v13, %v370_v55  ;;  %v279_v62 = vpop.permute.xlu0 %278  ;;  %v321_v39 = vperm.slane %v1387_v29, 0 }
  0xe6   : > { %v283_v63 = vsel %vm282_vm8, %v277_v46, %v279_v62  ;;  %v393_v0 = vmul.f32 %v385_v2, %v381_v61  ;;  %v394_v1 = vmul.f32 %v386_v3, %v380_v60 }
  0xe7   : > { %v300_v4 = vmul.f32 %v292_v54, %v283_v63 }
  0xe8   : > { %598 = vmatpush.msra.mxu0 %v393_v0  ;;  %618 = vmatpush.msra.mxu1 %v394_v1 }
  0xe9   : > { %661 = vmatpush.msra.mxu3 %v300_v4 }
  0xea   : > { %599 = vmatpush.msra.mxu0 %v361_v5  ;;  %619 = vmatpush.msra.mxu1 %v362_v6 }
  0xeb   : > { %823 = vmatmul.msk.f32.vlgmr.msra.gmra.mxu3 %vm582_vm9, %v541_v51 }
  0xec   : > { %v273_v8 = vpop.permute.xlu1 %272 }
  0xed   : > { %v306_v10 = vpop.permute.xlu0 %305  ;;  %v285_v13 = vsel %vm282_vm8, %v273_v8, %v275_v43  ;;  %v286_v14 = vsel %vm282_vm8, %v279_v62, %v273_v8 }
  0xee   : > { %v316_v15 = vsel %vm313_vm7, %v306_v10, %v308_v33  ;;  %v317_v16 = vsel %vm313_vm7, %v312_v48, %v306_v10  ;;  %v297_v19 = vmul.f32 %v289_v11, %v286_v14  ;;  %v298_v20 = vmul.f32 %v290_v12, %v285_v13 }
  0xef   : > { %v329_v17 = vmul.f32 %v321_v39, %v317_v16  ;;  %v330_v18 = vmul.f32 %v322_v7, %v316_v15 }
  0xf1   : > { %600 = vmatpush.msra.mxu0 %v329_v17  ;;  %620 = vmatpush.msra.mxu1 %v330_v18 }
  0xf3   : > { %601 = vmatpush.msra.mxu0 %v297_v19  ;;  %621 = vmatpush.msra.mxu1 %v298_v20 }
  0xf4   : > { %820 = vmatmul.msk.f32.vlgmr.msra.gmra.mxu0 %vm582_vm9, %v541_v51  ;;  %821 = vmatmul.msk.f32.vlgmr.msra.gmra.mxu1 %vm582_vm9, %v541_v51 }
 0x164   : > { %v643_v22 = vpop.f32.mrf.mxu2 }
 0x165   : > { %vm669_vm10 = vcmp.ge.f32.partialorder %v643_v22, 0.0  ;;  %v674_v9 = vmul.f32 %v671_v21, %v643_v22 }
 0x167   : > { %v678_v23 = vsel %vm669_vm10, %v643_v22, %v674_v9 }
 0x168   : > { %682 = vst [vmem:[%s265_s8 + $0x10] sm:$0xff] %v678_v23 }
 0x16e   : > { %v663_v24 = vpop.f32.mrf.mxu3 }
 0x16f   : > { %vm670_vm11 = vcmp.ge.f32.partialorder %v663_v24, 0.0  ;;  %v675_v25 = vmul.f32 %v671_v21, %v663_v24 }
 0x171   : > { %v679_v26 = vsel %vm670_vm11, %v663_v24, %v675_v25  ;;  %v603_v27 = vpop.f32.mrf.mxu0  ;;  %v623_v28 = vpop.f32.mrf.mxu1 }
 0x172   : > { %683 = vst [vmem:[%s265_s8 + $0x18] sm:$0xff] %v679_v26  ;;  %vm667_vm12 = vcmp.ge.f32.partialorder %v603_v27, 0.0  ;;  %v672_v29 = vmul.f32 %v671_v21, %v603_v27  ;;  %vm668_vm13 = vcmp.ge.f32.partialorder %v623_v28, 0.0  ;;  %v673_v30 = vmul.f32 %v671_v21, %v623_v28 }
 0x174   : > { %v676_v31 = vsel %vm667_vm12, %v603_v27, %v672_v29  ;;  %v677_v32 = vsel %vm668_vm13, %v623_v28, %v673_v30 }
 0x175   : > { %680 = vst [vmem:[%s265_s8] sm:$0xff] %v676_v31 }
 0x176   : > { %681 = vst [vmem:[%s265_s8 + $0x8] sm:$0xff] %v677_v32 }
 0x177   : > { %1046 = shalt.err (!%p1043_p0)
}
 0x178   : > { %845 = dma.vmem_to_hbm [thread:$0]  (%p1224_p2), %s701_s23, 512, %s703_s30, %s685_s20  }
 0x179 PF: > { %s714_s12 = sand.u32 1, %s1085_s17   ;;  %p859_p4 = pnand %p811_p8, %p1195_p5 }
 0x17a   : > { %s715_s6 = scalar_lea.sflag [#allocation6], %s714_s12 }
 0x17b   : > { %p860_p6 = pneg %p859_p4 }
 0x17d   : > { %1080 = dma.done.wait (%p860_p6), %s715_s6, 512  }
 0x17e   : > { %1082 = vsyncadd (%p860_p6), %s715_s6, 4294966784  ;;  %s22_s22 = sadd.s32 1, %s1105_s22   ;;  %s1490_s17 = smov %s1089_s18 }
 0x17f   : > { %p19_p9 = scmp.ge.s32.totalorder %s22_s22, 4   ;;  %s1491_s18 = smov %s1093_s19 }
 0x180   : > { %s1492_s19 = smov %s1234_s29  ;;  %s1493_s20 = smov %s1101_s21 }
 0x181   : > { %s1494_s21 = smov %s1496_s14  ;;  %21 = sbr.rel (!%p19_p9) target bundleno = 9 (0x9), region = 96 }
 0x186   :  { %721 = vsyncpa [#allocation5], 1 }
 0x187   :  { %723 = vsyncpa [#allocation5 + $0x1], 1 }
 0x188   :  { %724 = vsyncpa [#allocation8], 1 }
 0x189   :  { %725 = vsyncpa [#allocation6], 1 }
 0x18a   :  { %727 = vsyncpa [#allocation6 + $0x1], 1 }

</bundles_post_ra>
